<compile_context>
chip_gen: v7x
topology: tpu7x:2x2x1
jax: 0.10.0
libtpu: 0.0.40
codegen_flags: <defaults>
</compile_context>

<pallas_src>
import jax
import jax.numpy as jnp
from jax.experimental import pallas as pl
from jax.experimental.pallas import tpu as pltpu

N_EMBD = 384      # C (fixed by the module)
BLOCK_SIZE = 256  # causal-mask buffer size (only tril[:T,:T] is used)


def head_kernel(x_ref, wqkv_ref, o_ref):
    # x_ref:    (Bt, T, C)   bfloat16
    # wqkv_ref: (C, 3H)      bfloat16, columns ordered [q_scaled | k | v]
    # o_ref:    (Bt, T, H)   float32
    Bt, T, C = x_ref.shape
    H = o_ref.shape[-1]

    x = x_ref[...]                                   # (Bt, T, C) bf16
    w = wqkv_ref[...]                                # (C, 3H)    bf16

    # Fused QKV projection; flatten B*T so the MXU M dimension is filled.
    x2 = x.reshape(Bt * T, C)
    qkv = jnp.dot(x2, w, preferred_element_type=jnp.float32)   # (Bt*T, 3H) f32

    q = qkv[:, 0:H].reshape(Bt, T, H)        # already scaled by C**-0.5 (host)
    k = qkv[:, H:2 * H].reshape(Bt, T, H)
    v = qkv[:, 2 * H:3 * H].reshape(Bt, T, H)

    # Attention scores: batched q @ k^T without materializing a transpose.
    wei = jax.lax.dot_general(
        q.astype(jnp.bfloat16), k.astype(jnp.bfloat16),
        dimension_numbers=(((2,), (2,)), ((0,), (0,))),
        preferred_element_type=jnp.float32)                    # (Bt, T, T)

    # Causal mask: tril[:T, :T] == 0 -> -inf
    row = jax.lax.broadcasted_iota(jnp.int32, (T, T), 0)
    col = jax.lax.broadcasted_iota(jnp.int32, (T, T), 1)
    wei = jnp.where((col <= row)[None, :, :], wei, jnp.float32(-jnp.inf))

    # Numerically stable softmax along the last axis (f32).
    m = jnp.max(wei, axis=-1, keepdims=True)
    e = jnp.exp(wei - m)
    p = e * pl.reciprocal(jnp.sum(e, axis=-1, keepdims=True), approx=True)

    # TODO(synk): nn.Dropout(0.2) is identity in eval mode; train-mode random
    # masking (pltpu.prng_seed + prng_random_bits) is not reproduced here.

    out = jax.lax.dot_general(
        p.astype(jnp.bfloat16), v.astype(jnp.bfloat16),
        dimension_numbers=(((2,), (1,)), ((0,), (0,))),
        preferred_element_type=jnp.float32)                    # (Bt, T, H)
    o_ref[...] = out.astype(o_ref.dtype)


def _pick_batch_block(B, cap=8):
    """Largest divisor of B (<= cap) that still leaves >= 2 grid steps
    (so both v7x TensorCores get work), falling back to 1."""
    best = 1
    for bt in range(1, min(B, cap) + 1):
        if B % bt == 0 and (B // bt >= 2 or B == 1):
            best = bt
    return best


@jax.jit
def head_forward(x, wk, wq, wv):
    """x: (B, T, C) float32; wk/wq/wv: (C, H) float32 -> (B, T, H) float32."""
    B, T, C = x.shape
    H = wk.shape[1]

    # Fold the C**-0.5 score scale into the query weight (host side), fuse QKV
    # into one (C, 3H) weight, and cast matmul inputs to bf16.
    scale = jnp.float32(C) ** -0.5
    wqkv = jnp.concatenate([wq * scale, wk, wv], axis=1)       # (C, 3H)
    x_bf = x.astype(jnp.bfloat16)
    w_bf = wqkv.astype(jnp.bfloat16)

    Bt = _pick_batch_block(B)
    grid = (B // Bt,)

    cost = pl.CostEstimate(
        flops=2 * B * T * C * (3 * H) + 4 * B * T * T * H,
        transcendentals=B * T * T,
        bytes_accessed=(B * T * C * 2) + (C * 3 * H * 2) + (B * T * H * 4),
    )

    return pl.pallas_call(
        head_kernel,
        out_shape=jax.ShapeDtypeStruct((B, T, H), x.dtype),
        grid_spec=pltpu.PrefetchScalarGridSpec(
            num_scalar_prefetch=0,
            grid=grid,
            in_specs=[
                pl.BlockSpec((Bt, T, C), lambda b: (b, 0, 0)),
                pl.BlockSpec((C, 3 * H), lambda b: (0, 0)),
            ],
            out_specs=pl.BlockSpec((Bt, T, H), lambda b: (b, 0, 0)),
        ),
        compiler_params=pltpu.CompilerParams(
            dimension_semantics=("parallel",)),
        cost_estimate=cost,
    )(x_bf, w_bf)


def reference_head(x, wk, wq, wv):
    """Plain-JAX f32 reference mirroring the PyTorch forward (eval mode)."""
    B, T, C = x.shape
    k = x @ wk
    q = x @ wq
    v = x @ wv
    wei = jnp.einsum("btd,bsd->bts", q, k) * (C ** -0.5)
    tril = jnp.tril(jnp.ones((T, T), dtype=bool))
    wei = jnp.where(tril, wei, -jnp.inf)
    wei = jax.nn.softmax(wei, axis=-1)
    return wei @ v


if __name__ == "__main__":
    B, T, C = 4, 8, N_EMBD
    head_size = 64
    assert T <= BLOCK_SIZE

    key = jax.random.PRNGKey(0)
    kx, kk, kq, kv = jax.random.split(key, 4)
    x = jax.random.normal(kx, (B, T, C), dtype=jnp.float32)
    # nn.Linear(n_embd, head_size, bias=False) weight is (head_size, n_embd);
    # we store the transpose (n_embd, head_size) for direct x @ W.
    wscale = (1.0 / C) ** 0.5  # ~ PyTorch's kaiming-uniform bound scale
    wk = jax.random.uniform(kk, (C, head_size), jnp.float32, -wscale, wscale)
    wq = jax.random.uniform(kq, (C, head_size), jnp.float32, -wscale, wscale)
    wv = jax.random.uniform(kv, (C, head_size), jnp.float32, -wscale, wscale)

    out = head_forward(x, wk, wq, wv)
    out = jax.block_until_ready(out)

    ref = reference_head(x, wk, wq, wv)
    assert out.shape == (B, T, head_size)
    # bf16 matmul inputs + approx reciprocal -> slightly looser tolerance.
    assert jnp.allclose(out, ref, atol=2e-2, rtol=2e-2), "mismatch vs reference"

    print("KERNEL_OK")
</pallas_src>

<mosaic_0001>
module attributes {stable_mosaic.version = 11 : i64} {
  func.func @head_kernel(%arg0: i32, %arg1: memref<2x8x384xbf16, #tpu.memory_space<vmem>>, %arg2: memref<384x192xbf16, #tpu.memory_space<vmem>>, %arg3: memref<2x8x64xf32, #tpu.memory_space<vmem>>) attributes {dimension_semantics = [#tpu.dimension_semantics<parallel>], iteration_bounds = array<i64: 2>, scalar_prefetch = 0 : i64, scratch_operands = 0 : i64, tpu.core_type = #tpu.core_type<tc>, window_params = [{transform_indices = @transform_0, window_bounds = array<i64: 2, 8, 384>}, {pipeline_mode = #tpu.pipeline_mode<synchronous>, transform_indices = @transform_1, window_bounds = array<i64: 384, 192>}, {transform_indices = @transform_2, window_bounds = array<i64: 2, 8, 64>}]} {
    %c0 = arith.constant 0 : index
    %c0_0 = arith.constant 0 : index
    %c0_1 = arith.constant 0 : index
    %0 = vector.load %arg1[%c0, %c0_0, %c0_1] : memref<2x8x384xbf16, #tpu.memory_space<vmem>>, vector<2x8x384xbf16>
    %c0_2 = arith.constant 0 : index
    %c0_3 = arith.constant 0 : index
    %1 = vector.load %arg2[%c0_2, %c0_3] : memref<384x192xbf16, #tpu.memory_space<vmem>>, vector<384x192xbf16>
    %2 = vector.shape_cast %0 : vector<2x8x384xbf16> to vector<16x384xbf16>
    %cst = arith.constant dense<0.000000e+00> : vector<16x192xf32>
    %3 = tpu.matmul %2, %1, %cst {dimension_numbers = #tpu.dot_dimension_numbers<[1], [0], [0], [1], [0, 0, 1, 1], [], []>} : vector<16x384xbf16>, vector<384x192xbf16>, vector<16x192xf32> -> vector<16x192xf32>
    %4 = vector.extract_strided_slice %3 {offsets = [0, 0], sizes = [16, 64], strides = [1, 1]} : vector<16x192xf32> to vector<16x64xf32>
    %5 = vector.shape_cast %4 : vector<16x64xf32> to vector<2x8x64xf32>
    %6 = vector.extract_strided_slice %3 {offsets = [0, 64], sizes = [16, 64], strides = [1, 1]} : vector<16x192xf32> to vector<16x64xf32>
    %7 = vector.shape_cast %6 : vector<16x64xf32> to vector<2x8x64xf32>
    %8 = vector.extract_strided_slice %3 {offsets = [0, 128], sizes = [16, 64], strides = [1, 1]} : vector<16x192xf32> to vector<16x64xf32>
    %9 = vector.shape_cast %8 : vector<16x64xf32> to vector<2x8x64xf32>
    %10 = arith.truncf %5 : vector<2x8x64xf32> to vector<2x8x64xbf16>
    %11 = arith.truncf %7 : vector<2x8x64xf32> to vector<2x8x64xbf16>
    %cst_4 = arith.constant dense<0.000000e+00> : vector<2x8x8xf32>
    %12 = tpu.matmul %10, %11, %cst_4 {dimension_numbers = #tpu.dot_dimension_numbers<[2], [2], [1], [1], [0, 0, 0, 1, 1, 1], [0], [0]>} : vector<2x8x64xbf16>, vector<2x8x64xbf16>, vector<2x8x8xf32> -> vector<2x8x8xf32>
    %13 = tpu.iota {dimensions = array<i32: 0>} : vector<8x8xi32>
    %14 = tpu.iota {dimensions = array<i32: 1>} : vector<8x8xi32>
    %15 = arith.cmpi sle, %14, %13 : vector<8x8xi32>
    %16 = vector.shape_cast %15 : vector<8x8xi1> to vector<1x8x8xi1>
    %cst_5 = arith.constant 0xFF800000 : f32
    %17 = vector.shape_cast %16 : vector<1x8x8xi1> to vector<1x8x8xi1>
    %18 = vector.broadcast %17 : vector<1x8x8xi1> to vector<2x8x8xi1>
    %19 = vector.broadcast %cst_5 : f32 to vector<2x8x8xf32>
    %20 = arith.select %18, %12, %19 : vector<2x8x8xi1>, vector<2x8x8xf32>
    %cst_6 = arith.constant dense<0xFF800000> : vector<2x8xf32>
    %21 = vector.multi_reduction <maximumf>, %20, %cst_6 [2] : vector<2x8x8xf32> to vector<2x8xf32>
    %22 = vector.shape_cast %21 : vector<2x8xf32> to vector<2x8x1xf32>
    %23 = vector.broadcast %22 : vector<2x8x1xf32> to vector<2x8x8xf32>
    %24 = arith.subf %20, %23 : vector<2x8x8xf32>
    %25 = math.exp %24 : vector<2x8x8xf32>
    %cst_7 = arith.constant dense<0.000000e+00> : vector<2x8xf32>
    %26 = vector.multi_reduction <add>, %25, %cst_7 [2] : vector<2x8x8xf32> to vector<2x8xf32>
    %27 = vector.shape_cast %26 : vector<2x8xf32> to vector<2x8x1xf32>
    %28 = tpu.reciprocal %27 {approx = true} : vector<2x8x1xf32> -> vector<2x8x1xf32>
    %29 = vector.broadcast %28 : vector<2x8x1xf32> to vector<2x8x8xf32>
    %30 = arith.mulf %25, %29 : vector<2x8x8xf32>
    %31 = arith.truncf %30 : vector<2x8x8xf32> to vector<2x8x8xbf16>
    %32 = arith.truncf %9 : vector<2x8x64xf32> to vector<2x8x64xbf16>
    %cst_8 = arith.constant dense<0.000000e+00> : vector<2x8x64xf32>
    %33 = tpu.matmul %31, %32, %cst_8 {dimension_numbers = #tpu.dot_dimension_numbers<[2], [1], [1], [2], [0, 0, 0, 1, 1, 2], [0], [0]>} : vector<2x8x8xbf16>, vector<2x8x64xbf16>, vector<2x8x64xf32> -> vector<2x8x64xf32>
    %c0_9 = arith.constant 0 : index
    %c0_10 = arith.constant 0 : index
    %c0_11 = arith.constant 0 : index
    %34 = vector.load %arg3[%c0_9, %c0_10, %c0_11] : memref<2x8x64xf32, #tpu.memory_space<vmem>>, vector<2x8x64xf32>
    tpu.vector_store %arg3[%c0_9, %c0_10, %c0_11], %33 {strides = array<i32>} : memref<2x8x64xf32, #tpu.memory_space<vmem>>, vector<2x8x64xf32>,
    return
  }
  func.func @transform_0(%arg0: i32) -> (i32, i32, i32) {
    %c0_i32 = arith.constant 0 : i32
    %c0_i32_0 = arith.constant 0 : i32
    %c0_i32_1 = arith.constant 0 : i32
    return %arg0, %c0_i32, %c0_i32_0 : i32, i32, i32
  }
  func.func @transform_1(%arg0: i32) -> (i32, i32) {
    %c0_i32 = arith.constant 0 : i32
    %c0_i32_0 = arith.constant 0 : i32
    %c0_i32_1 = arith.constant 0 : i32
    return %c0_i32, %c0_i32_0 : i32, i32
  }
  func.func @transform_2(%arg0: i32) -> (i32, i32, i32) {
    %c0_i32 = arith.constant 0 : i32
    %c0_i32_0 = arith.constant 0 : i32
    %c0_i32_1 = arith.constant 0 : i32
    return %arg0, %c0_i32, %c0_i32_0 : i32, i32, i32
  }
}

</mosaic_0001>

<bundles_post_ra>
// kernel: head_forward.1
= control target key start
LH: loop header
LB: loop body
LE: loop exit
PB: predicated region body
PF: predicated region fallthrough
CT: control target
= control target key end

     0   :  { %7 = vsyncpa [#allocation3], 0  ;;  %s1448_s0 = inlined_call_operand.vmem [shape: bf16[4,8,384], index: 0, kind: input, shape index: {}]   ;;  %s1449_s1 = inlined_call_operand.vmem [shape: bf16[384,192], index: 1, kind: input, shape index: {}]   ;;  %s1450_s2 = inlined_call_operand.hbm [shape: f32[4,8,64], index: 2, kind: output, shape index: {}]  }
   0x1   :  { %9 = vsyncpa [#allocation3 + $0x1], 0  ;;  %s1171_s9 = smov 0   ;;  %s1173_s10 = smov 0  }
   0x2   :  { %s1175_s11 = smov 0   ;;  %s1177_s12 = smov 0  }
   0x3 LB: > { %s1192_s13 = sadd.s32 4294967295, %s1147_s12   ;;  %s851_s14 = sadd.s32 4294967294, %s1147_s12   ;;  %s1147_s12 = sphi %s1177_s12, %s1456_s12   ;;  %s1143_s11 = sphi %s1175_s11, %s1455_s11   ;;  %s1139_s10 = sphi %s1173_s10, %s1454_s10   ;;  %s1135_s9 = sphi %s1171_s9, %s1453_s9  }
   0x4   : > { %s1196_s15 = sadd.s32 1, %s1147_s12   ;;  %s69_s16 = sadd.s32 1, %s1143_s11 }
   0x5   : > { %s66_s17 = ssub.s32 %s1147_s12, %s1196_s15  ;;  %p79_p0 = scmp.ne.s32.totalorder %s1143_s11, %s1139_s10 }
   0x6   : > { %p67_p1 = scmp.eq.s32.totalorder %s66_s17, 0  ;;  %p80_p2 = scmp.eq.s32.totalorder %s1192_s13, 1 }
   0x7   : > { %p85_p3 = scmp.ne.s32.totalorder %s1139_s10, %s1135_s9  ;;  %p86_p4 = scmp.eq.s32.totalorder %s851_s14, 1 }
   0x8   : > { %s1207_s18 = scalar_select %p67_p1, %s1143_s11, %s69_s16  }
   0x9   : > { %p1209_p5 = por %p80_p2, %p79_p0  ;;  %p1213_p6 = por %p86_p4, %p85_p3 }
   0xa   : > { %p854_p7 = scmp.ge.s32.totalorder %s1147_s12, 1  ;;  %p117_p8 = scmp.lt.s32.totalorder %s1147_s12, 3 }
   0xc   : > { %p118_p9 = pnand %p854_p7, %p117_p8 }
   0xd   : > { %v1001_v0 = vld [vmem:[%s1449_s1 + $0x4] ss:$8 sps:$4 sm:$0xff] (!%p118_p9)   ;;  %v1003_v1 = vld [vmem:[%s1449_s1] ss:$8 sps:$4 sm:$0xff] (!%p118_p9)   ;;  %v1149_v2 = vmov (!%p118_p9), 0   ;;  %s856_s6 = sshll.u32 (!%p118_p9), %s1192_s13, 1 }
   0xe   : > { %121 = sbr.rel (%p118_p9) target bundleno = 1182 (0x49e), region = 28  ;;  %532 = vmatprep.mubr.bf16.mxu1 (!%p118_p9), %v1149_v2  ;;  %457 = vmatprep.subr.bf16.mxu0 (!%p118_p9), %v1001_v0  ;;  %v1004_v3 = vld [vmem:[%s1449_s1 + $0x14] ss:$8 sps:$4 sm:$0xff] (!%p118_p9)   ;;  %v1006_v4 = vld [vmem:[%s1449_s1 + $0x10] ss:$8 sps:$4 sm:$0xff] (!%p118_p9)   ;;  %p141_p10 = scmp.lt.s32.totalorder (!%p118_p9), %s856_s6, 3 }
   0xf   : > { %458 = vmatpush1.bf16.msra.mxu0 (!%p118_p9), %v1003_v1  ;;  %v1007_v5 = vld [vmem:[%s1449_s1 + $0x24] ss:$8 sps:$4 sm:$0xff] (!%p118_p9)   ;;  %v1009_v6 = vld [vmem:[%s1449_s1 + $0x20] ss:$8 sps:$4 sm:$0xff] (!%p118_p9)   ;;  %v1010_v7 = vld [vmem:[%s1449_s1 + $0x34] ss:$8 sps:$4 sm:$0xff] (!%p118_p9)  }
  0x10   : > { %459 = vmatprep.subr.bf16.mxu0 (!%p118_p9), %v1004_v3  ;;  %v1012_v8 = vld [vmem:[%s1449_s1 + $0x30] ss:$8 sps:$4 sm:$0xff] (!%p118_p9)   ;;  %v1025_v9 = vld [vmem:[%s1449_s1 + $0x104] ss:$8 sps:$4 sm:$0xff] (!%p118_p9)   ;;  %v1027_v10 = vld [vmem:[%s1449_s1 + $0x100] ss:$8 sps:$4 sm:$0xff] (!%p118_p9)  }
  0x11   : > { %v1013_v11 = vld [vmem:[%s1449_s1 + $0x44] ss:$8 sps:$4 sm:$0xff] (!%p118_p9)   ;;  %500 = vmatprep.subr.bf16.mxu1 (!%p118_p9), %v1025_v9  ;;  %v1031_v12 = vld [vmem:[%s1449_s1 + $0x114] ss:$8 sps:$4 sm:$0xff] (!%p118_p9)   ;;  %v1033_v13 = vld [vmem:[%s1449_s1 + $0x110] ss:$8 sps:$4 sm:$0xff] (!%p118_p9)  }
  0x12   : > { %501 = vmatpush1.bf16.msra.mxu1 (!%p118_p9), %v1027_v10  ;;  %v1015_v14 = vld [vmem:[%s1449_s1 + $0x40] ss:$8 sps:$4 sm:$0xff] (!%p118_p9)   ;;  %v1016_v15 = vld [vmem:[%s1449_s1 + $0x54] ss:$8 sps:$4 sm:$0xff] (!%p118_p9)   ;;  %v1037_v16 = vld [vmem:[%s1449_s1 + $0x124] ss:$8 sps:$4 sm:$0xff] (!%p118_p9)  }
  0x13   : > { %460 = vmatpush1.bf16.msra.mxu0 (!%p118_p9), %v1006_v4  ;;  %502 = vmatprep.subr.bf16.mxu1 (!%p118_p9), %v1031_v12  ;;  %v1039_v17 = vld [vmem:[%s1449_s1 + $0x120] ss:$8 sps:$4 sm:$0xff] (!%p118_p9)   ;;  %v1018_v18 = vld [vmem:[%s1449_s1 + $0x50] ss:$8 sps:$4 sm:$0xff] (!%p118_p9)   ;;  %v1043_v19 = vld [vmem:[%s1449_s1 + $0x134] ss:$8 sps:$4 sm:$0xff] (!%p118_p9)  }
  0x14   : > { %461 = vmatprep.subr.bf16.mxu0 (!%p118_p9), %v1007_v5  ;;  %v1019_v20 = vld [vmem:[%s1449_s1 + $0x64] ss:$8 sps:$4 sm:$0xff] (!%p118_p9)   ;;  %v1045_v21 = vld [vmem:[%s1449_s1 + $0x130] ss:$8 sps:$4 sm:$0xff] (!%p118_p9)   ;;  %v1021_v22 = vld [vmem:[%s1449_s1 + $0x60] ss:$8 sps:$4 sm:$0xff] (!%p118_p9)  }
  0x15   : > { %v1049_v23 = vld [vmem:[%s1449_s1 + $0x144] ss:$8 sps:$4 sm:$0xff]   ;;  %s1458_s6 = smov (!%p141_p10, %s856_s6), 3  ;;  %v1022_v24 = vld [vmem:[%s1449_s1 + $0x74] ss:$8 sps:$4 sm:$0xff]   ;;  %v1150_v56 = vmov 0.0  }
  0x16   : > { %503 = vmatpush1.bf16.msra.mxu1 %v1033_v13  ;;  %v1051_v25 = vld [vmem:[%s1449_s1 + $0x140] ss:$8 sps:$4 sm:$0xff]   ;;  %v1024_v26 = vld [vmem:[%s1449_s1 + $0x70] ss:$8 sps:$4 sm:$0xff]   ;;  %v1055_v27 = vld [vmem:[%s1449_s1 + $0x154] ss:$8 sps:$4 sm:$0xff]  }
  0x17   : > { %462 = vmatpush1.bf16.msra.mxu0 %v1009_v6  ;;  %504 = vmatprep.subr.bf16.mxu1 %v1037_v16  ;;  %s955_s17 = smul.u32 12, %s1458_s6  ;;  %v1028_v28 = vld [vmem:[%s1449_s1 + $0x84] ss:$8 sps:$4 sm:$0xff]   ;;  %v1057_v29 = vld [vmem:[%s1449_s1 + $0x150] ss:$8 sps:$4 sm:$0xff]   ;;  %vm1151_vm0 = vmmov 0  }
  0x18   : > { %463 = vmatprep.subr.bf16.mxu0 %v1010_v7  ;;  %v1030_v30 = vld [vmem:[%s1449_s1 + $0x80] ss:$8 sps:$4 sm:$0xff]   ;;  %v1061_v31 = vld [vmem:[%s1449_s1 + $0x164] ss:$8 sps:$4 sm:$0xff]   ;;  %v1034_v32 = vld [vmem:[%s1449_s1 + $0x94] ss:$8 sps:$4 sm:$0xff]  }
  0x19   : > { %s1316_s30 = scalar_lea.vmem %s1448_s0, %s955_s17  ;;  %v1063_v33 = vld [vmem:[%s1449_s1 + $0x160] ss:$8 sps:$4 sm:$0xff]   ;;  %v1036_v35 = vld [vmem:[%s1449_s1 + $0x90] ss:$8 sps:$4 sm:$0xff]   ;;  %v1067_v36 = vld [vmem:[%s1449_s1 + $0x174] ss:$8 sps:$4 sm:$0xff]  }
  0x1a   : > { %505 = vmatpush1.bf16.msra.mxu1 %v1039_v17  ;;  %v1076_v34 = vld [vmem:[%s1316_s30 + $0x4] ss:$12 sps:$4 sm:$0xff]   ;;  %v1042_v39 = vld [vmem:[%s1449_s1 + $0xa0] ss:$8 sps:$4 sm:$0xff]   ;;  %v1046_v40 = vld [vmem:[%s1449_s1 + $0xb4] ss:$8 sps:$4 sm:$0xff]  }
  0x1b   : > { %464 = vmatpush1.bf16.msra.mxu0 %v1012_v8  ;;  %506 = vmatprep.subr.bf16.mxu1 %v1043_v19  ;;  %v1040_v37 = vld [vmem:[%s1449_s1 + $0xa4] ss:$8 sps:$4 sm:$0xff]   ;;  %v1069_v38 = vld [vmem:[%s1449_s1 + $0x170] ss:$8 sps:$4 sm:$0xff]   ;;  %v1073_v41 = vld [vmem:[%s1316_s30 + $0x8] ss:$12 sps:$4 sm:$0xff]  }
  0x1c   : > { %465 = vmatprep.subr.bf16.mxu0 %v1013_v11  ;;  %489 = vmatprep.mubr.bf16.mxu0 %v1076_v34  ;;  %v1048_v42 = vld [vmem:[%s1449_s1 + $0xb0] ss:$8 sps:$4 sm:$0xff]   ;;  %v1052_v43 = vld [vmem:[%s1449_s1 + $0xc4] ss:$8 sps:$4 sm:$0xff]   ;;  %v1054_v44 = vld [vmem:[%s1449_s1 + $0xc0] ss:$8 sps:$4 sm:$0xff]   ;;  %v644_v11 = vlaneseq }
  0x1d   : > { %v1058_v45 = vld [vmem:[%s1449_s1 + $0xd4] ss:$8 sps:$4 sm:$0xff]   ;;  %v1060_v46 = vld [vmem:[%s1449_s1 + $0xd0] ss:$8 sps:$4 sm:$0xff]   ;;  %v1064_v47 = vld [vmem:[%s1449_s1 + $0xe4] ss:$8 sps:$4 sm:$0xff]  }
  0x1e   : > { %507 = vmatpush1.bf16.msra.mxu1 %v1045_v21  ;;  %v1066_v48 = vld [vmem:[%s1449_s1 + $0xe0] ss:$8 sps:$4 sm:$0xff]   ;;  %v1070_v49 = vld [vmem:[%s1449_s1 + $0xf4] ss:$8 sps:$4 sm:$0xff]   ;;  %v1072_v50 = vld [vmem:[%s1449_s1 + $0xf0] ss:$8 sps:$4 sm:$0xff]  }
  0x1f   : > { %466 = vmatpush1.bf16.msra.mxu0 %v1015_v14  ;;  %508 = vmatprep.subr.bf16.mxu1 %v1049_v23  ;;  %v1074_v51 = vld [vmem:[%s1316_s30] ss:$12 sps:$4 sm:$0xff]   ;;  %s1152_s30 = smov 64   ;;  %vm683_vm1 = vcmask 1043456   ;;  %vm548_vm2 = vcmask 523264   ;;  %v645_v12 = vshrl.u32 %v644_v11, 7 }
  0x20   : > { %467 = vmatprep.subr.bf16.mxu0 %v1016_v15  ;;  %v647_v13 = vand.u32 127, %v644_v11  ;;  %vm653_vm4 = vcmask 64512   ;;  %s137_s6 = sand.u32 1, %s1139_s10   ;;  %s918_s5 = sshll.u32 %s1192_s13, 8 }
  0x21   : > { %s855_s29 = sshll.u32 %s137_s6, 4  ;;  %s1404_s14 = scalar_lea.hbm %s1450_s2, %s918_s5 }
  0x22   : > { %509 = vmatpush1.bf16.msra.mxu1 %v1051_v25  ;;  %vm648_vm3 = vcmp.le.s32.totalorder %v647_v13, %v645_v12  ;;  %s139_s3 = scalar_lea.vmem [#allocation2], %s855_s29  ;;  %s1407_s16 = scalar_lea.sflag [#allocation3], %s137_s6 }
  0x23   : > { %468 = vmatpush1.bf16.msra.mxu0 %v1018_v18  ;;  %510 = vmatprep.subr.bf16.mxu1 %v1055_v27  ;;  %s789_s4 = sshll.u32 %s139_s3, 4  ;;  %s1153_s13 = smov [#allocation2]   ;;  %s1399_s4 = int_to_ptr.vmem [resolvable:$true] %s789_s4 }
  0x24   : > { %469 = vmatprep.subr.bf16.mxu0 %v1019_v20  ;;  %s1085_s17 = scalar_lea.vmem %s1399_s4, 256  ;;  %s1089_s21 = sshll.u32 %s1153_s13, 4  ;;  %s1090_s21 = int_to_ptr.vmem [resolvable:$false] %s1089_s21 }
  0x25   : > { %p1086_p11 = scmp.ne.s32.totalorder %s1399_s4, %s1085_s17  ;;  %s1091_s22 = scalar_lea.vmem %s1090_s21, 512 }
  0x26   : > { %511 = vmatpush1.bf16.msra.mxu1 %v1057_v29  ;;  %p1092_p0 = scmp.lt.s32.totalorder %s1399_s4, %s1090_s21  ;;  %p1093_p1 = scmp.lt.s32.totalorder %s1091_s22, %s1085_s17 }
  0x27   : > { %470 = vmatpush1.bf16.msra.mxu0 %v1021_v22  ;;  %512 = vmatprep.subr.bf16.mxu1 %v1061_v31  ;;  %p1087_p12 = pnand %p1086_p11, %p1209_p5 }
  0x28   : > { %471 = vmatprep.subr.bf16.mxu0 %v1022_v24  ;;  %p1094_p2 = por %p1093_p1, %p1092_p0 }
  0x29   : > { %p1088_p13 = pneg %p1087_p12 }
  0x2a   : > { %513 = vmatpush1.bf16.msra.mxu1 %v1063_v33 }
  0x2b   : > { %472 = vmatpush1.bf16.msra.mxu0 %v1024_v26  ;;  %514 = vmatprep.subr.bf16.mxu1 %v1067_v36  ;;  %p1095_p3 = pnand %p1094_p2, %p1088_p13 }
  0x2c   : > { %473 = vmatprep.subr.bf16.mxu0 %v1028_v28 }
  0x2e   : > { %515 = vmatpush1.bf16.msra.mxu1 %v1069_v38 }
  0x2f   : > { %474 = vmatpush1.bf16.msra.mxu0 %v1030_v30  ;;  %927 = vmatprep.subr.bf16.mxu1 %v1150_v56 }
  0x30   : > { %475 = vmatprep.subr.bf16.mxu0 %v1034_v32 }
  0x31   : > { %533 = vmatmul.mubr.bf16.vlgmr.msra.gmra.mrb[0].mxu1 %v1073_v41 }
  0x32   : > { %929 = vmatprep.mubr.msk.bf16.mxu1 %vm1151_vm0, %v1150_v56 }
  0x33   : > { %476 = vmatpush1.bf16.msra.mxu0 %v1036_v35 }
  0x34   : > { %477 = vmatprep.subr.bf16.mxu0 %v1040_v37 }
  0x37   : > { %478 = vmatpush1.bf16.msra.mxu0 %v1042_v39 }
  0x38   : > { %479 = vmatprep.subr.bf16.mxu0 %v1046_v40 }
  0x3b   : > { %480 = vmatpush1.bf16.msra.mxu0 %v1048_v42 }
  0x3c   : > { %481 = vmatprep.subr.bf16.mxu0 %v1052_v43 }
  0x3f   : > { %482 = vmatpush1.bf16.msra.mxu0 %v1054_v44 }
  0x40   : > { %483 = vmatprep.subr.bf16.mxu0 %v1058_v45 }
  0x43   : > { %484 = vmatpush1.bf16.msra.mxu0 %v1060_v46 }
  0x44   : > { %485 = vmatprep.subr.bf16.mxu0 %v1064_v47 }
  0x47   : > { %486 = vmatpush1.bf16.msra.mxu0 %v1066_v48 }
  0x48   : > { %487 = vmatprep.subr.bf16.mxu0 %v1070_v49 }
  0x4b   : > { %488 = vmatpush1.bf16.msra.mxu0 %v1072_v50 }
  0x4e   : > { %490 = vmatmul.mubr.bf16.vlgmr.msra.gmra.mrb[0].mxu0 %v1074_v51 }
 0x104   : > { %v534_v52 = vpop.f32.mrb[0].mxu1 }
 0x105   : > { %v536_v53 = vpop.f32.mrb[1].mxu1 }
 0x106   : > { %v538_v54 = vpop.f32.mrb[2].mxu1 }
 0x107   : > { %v540_v55 = vpop.f32.mrb[3].mxu1 }
 0x121   : > { %v491_v57 = vpop.f32.mrb[0].mxu0 }
 0x122   : > { %v535_v58 = vadd.f32 %v534_v52, %v491_v57  ;;  %v493_v59 = vpop.f32.mrb[1].mxu0 }
 0x123   : > { %v537_v60 = vadd.f32 %v536_v53, %v493_v59  ;;  %v495_v61 = vpop.f32.mrb[2].mxu0 }
 0x124   : > { %v543_v62 = vpack.c.bf16 %v535_v58, %v535_v58  ;;  %v539_v63 = vadd.f32 %v538_v54, %v495_v61  ;;  %v497_v0 = vpop.f32.mrb[3].mxu0 }
 0x125   : > { %v541_v1 = vadd.f32 %v540_v55, %v497_v0  ;;  %v678_v9 = vpack.c.bf16 %v537_v60, %v537_v60 }
 0x126   : > { %546 = vrot.lane.b32.xlu0 %v543_v62, %s1152_s30  ;;  %v544_v3 = vpack.c.bf16 %v539_v63, %v539_v63 }
 0x127   : > { %v679_v2 = vpack.c.bf16 %v541_v1, %v541_v1  ;;  %v685_v10 = vsel %vm683_vm1, %v678_v9, 0 }
 0x129   : > { %v731_v4 = vsel %vm683_vm1, %v679_v2, 0 }
 0x12a   : > { %596 = vrot.lane.b32.xlu0 %v544_v3, %s1152_s30 }
 0x198   : > { %v547_v5 = vpop.permute.xlu0 %546 }
 0x199   : > { %v553_v6 = vsel %vm548_vm2, %v547_v5, 0 }
 0x19a   : > { %928 = vmatpush3.bf16.xpose.msra.mxu1 %v553_v6 }
 0x19b   : > { %933 = vmatprep.subr.bf16.mxu1 %v1150_v56 }
 0x19c   : > { %v597_v7 = vpop.permute.xlu0 %596 }
 0x19d   : > { %v602_v8 = vsel %vm548_vm2, %v597_v7, 0 }
 0x1a1   : > { %930 = vmatmul.mubr.msk.bf16.vlgmr.msra.gmra.mrb[4].mxu1 %vm548_vm2, %v543_v62 }
 0x1a2   : > { %934 = vmatpush3.bf16.xpose.msra.mxu1 %v602_v8  ;;  %935 = vmatprep.mubr.msk.bf16.mxu1 %vm1151_vm0, %v1150_v56 }
 0x1a3   : > { %939 = vmatprep.subr.bf16.mxu1 %v1150_v56 }
 0x1a9   : > { %936 = vmatmul.mubr.msk.bf16.vlgmr.msra.gmra.mrb[8].mxu1 %vm548_vm2, %v544_v3 }
 0x1aa   : > { %940 = vmatpush3.bf16.msra.mxu1 %v685_v10  ;;  %941 = vmatprep.mubr.msk.bf16.mxu1 %vm1151_vm0, %v1150_v56 }
 0x1ab   : > { %945 = vmatprep.subr.bf16.mxu1 %v1150_v56 }
 0x274   : > { %v589_v14 = vpop.f32.mrb[4].mxu1 }
 0x275   : > { %v651_v15 = vsel %vm648_vm3, %v589_v14, -inf  ;;  %v931_v16 = vpop.f32.mrb[5].mxu1 }
 0x276   : > { %v592_v17 = vpop.f32.mrb[6].mxu1  ;;  %v654_v18 = vsel %vm653_vm4, %v651_v15, -inf }
 0x277   : > { %655 = vmax.xlane.f32.xlu1 %v654_v18  ;;  %v932_v19 = vpop.f32.mrb[7].mxu1 }
 0x27c   : > { %v638_v20 = vpop.f32.mrb[8].mxu1 }
 0x27d   : > { %v652_v21 = vsel %vm648_vm3, %v638_v20, -inf  ;;  %v937_v22 = vpop.f32.mrb[9].mxu1 }
 0x27e   : > { %v641_v23 = vpop.f32.mrb[10].mxu1  ;;  %v657_v24 = vsel %vm653_vm4, %v652_v21, -inf }
 0x27f   : > { %658 = vmax.xlane.f32.xlu1 %v657_v24  ;;  %v938_v25 = vpop.f32.mrb[11].mxu1 }
 0x304   : > { %v656_v26 = vpop.xlane.xlu1 %655 }
 0x305   : > { %v660_v27 = vsub.f32 %v651_v15, %v656_v26 }
 0x307   : > { %v662_v28 = vmul.f32 1.442695, %v660_v27 }
 0x309   : > { %1077 = vpow2.f32 %v662_v28 }
 0x30c   : > { %v659_v29 = vpop.xlane.xlu1 %658 }
 0x30d   : > { %v661_v30 = vsub.f32 %v652_v21, %v659_v29 }
 0x30f   : > { %v664_v31 = vmul.f32 1.442695, %v661_v30 }
 0x311   : > { %1079 = vpow2.f32 %v664_v31 }
 0x313   : > { %v1078_v32 = vpop.eup %1077 }
 0x314   : > { %v666_v33 = vsel %vm653_vm4, %v1078_v32, 0.0 }
 0x315   : > { %667 = vadd.xlane.f32.xlu0 %v666_v33 }
 0x31b   : > { %v1080_v34 = vpop.eup %1079 }
 0x31c   : > { %v669_v35 = vsel %vm653_vm4, %v1080_v34, 0.0 }
 0x31d   : > { %670 = vadd.xlane.f32.xlu1 %v669_v35 }
 0x3a2   : > { %v668_v36 = vpop.xlane.xlu0 %667 }
 0x3a3   : > { %1081 = vrcp.f32 %v668_v36 }
 0x3aa   : > { %v671_v37 = vpop.xlane.xlu1 %670 }
 0x3ab   : > { %1083 = vrcp.f32 %v671_v37 }
 0x3ad   : > { %v1082_v38 = vpop.eup %1081 }
 0x3ae   : > { %v674_v39 = vmul.f32 %v1082_v38, %v1078_v32 }
 0x3b0   : > { %v676_v40 = vpack.c.bf16 %v674_v39, %v674_v39 }
 0x3b2   : > { %942 = vmatmul.mubr.msk.bf16.vlgmr.msra.gmra.mrb[12].mxu1 %vm653_vm4, %v676_v40 }
 0x3b3   : > { %946 = vmatpush3.bf16.msra.mxu1 %v731_v4  ;;  %947 = vmatprep.mubr.msk.bf16.mxu1 %vm1151_vm0, %v1150_v56 }
 0x3b5   : > { %v1084_v41 = vpop.eup %1083 }
 0x3b6   : > { %v675_v42 = vmul.f32 %v1084_v41, %v1080_v34 }
 0x3b8   : > { %v677_v43 = vpack.c.bf16 %v675_v42, %v675_v42 }
 0x3ba   : > { %948 = vmatmul.mubr.msk.bf16.vlgmr.msra.gmra.mrb[16].mxu1 %vm653_vm4, %v677_v43 }
 0x485   : > { %v721_v44 = vpop.f32.mrb[12].mxu1 }
 0x486   : > { %773 = vst.msk [vmem:[%s139_s3] sm:$0xff] %vm548_vm2, %v721_v44  ;;  %v943_v45 = vpop.f32.mrb[13].mxu1 }
 0x487   : > { %v724_v46 = vpop.f32.mrb[14].mxu1 }
 0x488   : > { %v944_v47 = vpop.f32.mrb[15].mxu1 }
 0x48d   : > { %v767_v48 = vpop.f32.mrb[16].mxu1 }
 0x48e   : > { %774 = vst.msk [vmem:[%s139_s3 + $0x8] sm:$0xff] %vm548_vm2, %v767_v48  ;;  %v949_v49 = vpop.f32.mrb[17].mxu1 }
 0x48f   : > { %v770_v50 = vpop.f32.mrb[18].mxu1 }
 0x490   : > { %1098 = shalt.err (!%p1095_p3)
}
 0x491   : > { %s1099_s23 = scalar_lea.hbm %s1404_s14, 256  ;;  %s1103_s26 = scalar_lea.hbm %s1450_s2, 512 }
 0x492   : > { %p1100_p4 = scmp.ne.s32.totalorder %s1404_s14, %s1099_s23  ;;  %p1104_p9 = scmp.lt.u32.totalorder %s1404_s14, %s1450_s2 }
 0x493   : > { %p1105_p10 = scmp.lt.u32.totalorder %s1103_s26, %s1099_s23  ;;  %p1107_p12 = scmp.lt.u32.totalorder %s1099_s23, %s1404_s14 }
 0x494   : > { %p1101_p7 = pnand %p1100_p4, %p1209_p5 }
 0x495   : > { %p1106_p11 = por %p1105_p10, %p1104_p9 }
 0x496   : > { %p1102_p8 = pneg %p1101_p7 }
 0x497   : > { %p1108_p13 = por %p1107_p12, %p1106_p11 }
 0x499   : > { %p1109_p0 = pnand %p1108_p13, %p1102_p8 }
 0x49b   : > { %1112 = shalt.err (!%p1109_p0)
}
 0x49c   : > { %s1154_s30 = smov 128   ;;  %s1155_s6 = smov 8   ;;  %v950_v51 = vpop.f32.mrb[19].mxu1 }
 0x49d   : > { %956 = dma.vmem_to_hbm [thread:$0]  (%p1209_p5), %s1399_s4, 256, %s1404_s14, %s1407_s16, %s1154_s30, %s1154_s30, %s1155_s6  }
 0x49e PF: > { %p962_p1 = scmp.ge.s32.totalorder %s1147_s12, 2  ;;  %s804_s29 = sand.u32 1, %s1135_s9  }
 0x49f   : > { %s805_s3 = scalar_lea.sflag [#allocation3], %s804_s29 }
 0x4a0   : > { %p959_p2 = pnand %p962_p1, %p1213_p6 }
 0x4a2   : > { %1130 = dma.done.wait (!%p959_p2), %s805_s3, 256  }
 0x4a3   : > { %1132 = vsyncadd (!%p959_p2), %s805_s3, 4294967040  ;;  %p12_p3 = scmp.ge.s32.totalorder %s1196_s15, 4   ;;  %s1453_s9 = smov %s1139_s10 }
 0x4a4   : > { %s1454_s10 = smov %s1143_s11  ;;  %s1455_s11 = smov %s1207_s18 }
 0x4a5   : > { %s1456_s12 = smov %s1196_s15  ;;  %14 = sbr.rel (!%p12_p3) target bundleno = 3 (0x3), region = 63 }
 0x4ac   :  { %810 = vsyncpa [#allocation3], 1 }
 0x4ad   :  { %812 = vsyncpa [#allocation3 + $0x1], 1 }

</bundles_post_ra>
